<compile_context>
chip_gen: v7x
topology: tpu7x:2x2x1
jax: 0.10.0
libtpu: 0.0.40
codegen_flags: <defaults>
</compile_context>

<pallas_src>
import functools

import jax
import jax.numpy as jnp
from jax.experimental import pallas as pl
from jax.experimental.pallas import tpu as pltpu


# -----------------------------------------------------------------------------
# Fused kernel: conv1d(K,stride) as one im2col dot + GELU -> running mean-pool
# accumulator -> (on last seq chunk) Linear/ReLU/Linear classifier.
# Grid: (batch_blocks [parallel], seq_chunks [arbitrary]).
# -----------------------------------------------------------------------------
def fused_forward_kernel(patches_ref, wc_ref, bc_ref, w1_ref, b1_ref,
                         w2_ref, b2_ref, o_ref, acc_ref, *, inv_seq_len):
    # patches_ref: (TB, TS, KPAD) bf16  im2col'd audio frames (K zero-padded to 128)
    # wc_ref     : (KPAD, HPAD)   bf16  conv weight (zero-padded)
    # bc_ref     : (1, HPAD)      f32   conv bias   (zero-padded)
    # w1_ref     : (HPAD, D1PAD)  bf16, b1_ref: (1, D1PAD) f32
    # w2_ref     : (D1PAD, DPAD)  bf16 (cols >= 2 are zero), b2_ref: (1, DPAD) f32
    # o_ref      : (TB, DPAD)     f32   lane-dense padded logits
    # acc_ref    : (TB, HPAD)     f32   running sum of hidden states over seq
    s = pl.program_id(1)
    TB, TS, KPAD = patches_ref.shape

    @pl.when(s == 0)
    def _init():
        acc_ref[...] = jnp.zeros_like(acc_ref)

    # ---- feature encoder: ONE bf16 MXU dot over the merged (TB*TS, KPAD) block ----
    p = patches_ref[...].reshape(TB * TS, KPAD)                 # bf16, lane-dense
    h = jnp.dot(p, wc_ref[...], preferred_element_type=jnp.float32)
    h = jax.nn.gelu(h + bc_ref[...])                            # (TB*TS, HPAD) == hidden

    # ---- mean over seq: plain f32 sum into the VMEM accumulator (no MXU pass) ----
    acc_ref[...] += h.reshape(TB, TS, -1).sum(axis=1)

    # ---- last chunk: scale by 1/S, classifier Linear->ReLU->(Dropout: id)->Linear ----
    @pl.when(s == pl.num_programs(1) - 1)
    def _finalize():
        pooled = acc_ref[...] * inv_seq_len                     # (TB, HPAD) f32
        z1 = jnp.dot(pooled.astype(jnp.bfloat16), w1_ref[...],
                     preferred_element_type=jnp.float32) + b1_ref[...]
        a1 = jnp.maximum(z1, 0.0)                               # ReLU; Dropout = identity (eval)
        o_ref[...] = jnp.dot(a1.astype(jnp.bfloat16), w2_ref[...],
                             preferred_element_type=jnp.float32) + b2_ref[...]


# -----------------------------------------------------------------------------
# Wrapper: layout plumbing (im2col, zero-padding to lane/sublane-dense shapes,
# bf16 pre-casts).  All compute happens inside the single pallas_call.
# -----------------------------------------------------------------------------
def wav2vec_classifier_forward(x, params, *, kernel_size, stride):
    B, T = x.shape
    K = kernel_size
    S = (T - K) // stride + 1
    H = params["w_conv"].shape[1]
    D1 = params["w1"].shape[1]
    D2 = params["w2"].shape[1]

    def rup(v, m):
        return ((v + m - 1) // m) * m

    TB = 8                      # batch tile (sublane-dense output / accumulator)
    TS = 8                      # seq frames per grid step
    # TODO(synk): ragged sequence tails would need an in-kernel frame mask.
    assert S % TS == 0, "sequence length must be a multiple of the seq tile"

    BPAD = rup(B, TB)
    KPAD = rup(K, 128)
    HPAD = rup(H, 128)
    D1PAD = rup(D1, 128)
    DPAD = rup(max(D2, 128), 128)

    # im2col in the wrapper: (B, S, K) overlapping frames of the raw audio.
    idx = jnp.arange(S)[:, None] * stride + jnp.arange(K)[None, :]
    patches = x[:, idx]                                             # (B, S, K) f32
    patches = jnp.pad(patches, ((0, BPAD - B), (0, 0), (0, KPAD - K)))
    patches = patches.astype(jnp.bfloat16)                          # halve DMA bytes

    bf16 = jnp.bfloat16
    wc = jnp.zeros((KPAD, HPAD), bf16).at[:K, :H].set(params["w_conv"].astype(bf16))
    bc = jnp.zeros((1, HPAD), jnp.float32).at[:, :H].set(params["b_conv"])
    w1 = jnp.zeros((HPAD, D1PAD), bf16).at[:H, :D1].set(params["w1"].astype(bf16))
    b1 = jnp.zeros((1, D1PAD), jnp.float32).at[:, :D1].set(params["b1"])
    w2 = jnp.zeros((D1PAD, DPAD), bf16).at[:D1, :D2].set(params["w2"].astype(bf16))
    b2 = jnp.zeros((1, DPAD), jnp.float32).at[:, :D2].set(params["b2"])

    grid = (BPAD // TB, S // TS)
    kernel = functools.partial(fused_forward_kernel, inv_seq_len=1.0 / S)

    logits_padded = pl.pallas_call(
        kernel,
        out_shape=jax.ShapeDtypeStruct((BPAD, DPAD), jnp.float32),
        grid_spec=pltpu.PrefetchScalarGridSpec(
            num_scalar_prefetch=0,
            grid=grid,
            in_specs=[
                pl.BlockSpec((TB, TS, KPAD), lambda b, s: (b, s, 0)),   # patches
                pl.BlockSpec((KPAD, HPAD), lambda b, s: (0, 0)),        # conv weight
                pl.BlockSpec((1, HPAD), lambda b, s: (0, 0)),           # conv bias
                pl.BlockSpec((HPAD, D1PAD), lambda b, s: (0, 0)),       # w1
                pl.BlockSpec((1, D1PAD), lambda b, s: (0, 0)),          # b1
                pl.BlockSpec((D1PAD, DPAD), lambda b, s: (0, 0)),       # w2 (padded)
                pl.BlockSpec((1, DPAD), lambda b, s: (0, 0)),           # b2 (padded)
            ],
            out_specs=pl.BlockSpec((TB, DPAD), lambda b, s: (b, 0)),
            scratch_shapes=[pltpu.VMEM((TB, HPAD), jnp.float32)],       # pooled-sum acc
        ),
        compiler_params=pltpu.CompilerParams(
            dimension_semantics=("parallel", "arbitrary"),
            vmem_limit_bytes=32 * 1024 * 1024,
        ),
    )(patches, wc, bc, w1, b1, w2, b2)

    return logits_padded[:B, :D2]


if __name__ == "__main__":
    # Small, deterministic synthetic configuration
    B = 2          # batch
    KERNEL = 10    # first wav2vec2 conv layer kernel size
    STRIDE = 5     # first wav2vec2 conv layer stride
    S = 16         # frames after the conv
    T = STRIDE * (S - 1) + KERNEL   # raw audio samples -> 85
    H = 32         # (synthetic, small) wav2vec hidden_size
    D1 = 128       # classifier hidden
    D2 = 2         # classes

    key = jax.random.PRNGKey(0)
    kx, kwc, kbc, kw1, kb1, kw2, kb2 = jax.random.split(key, 7)

    x = jax.random.normal(kx, (B, T), dtype=jnp.float32)

    params = {
        "w_conv": jax.random.normal(kwc, (KERNEL, H), dtype=jnp.float32) * 0.1,
        "b_conv": jax.random.normal(kbc, (1, H), dtype=jnp.float32) * 0.01,
        "w1": jax.random.normal(kw1, (H, D1), dtype=jnp.float32) * 0.1,
        "b1": jax.random.normal(kb1, (1, D1), dtype=jnp.float32) * 0.01,
        "w2": jax.random.normal(kw2, (D1, D2), dtype=jnp.float32) * 0.1,
        "b2": jax.random.normal(kb2, (1, D2), dtype=jnp.float32) * 0.01,
    }

    logits = wav2vec_classifier_forward(x, params, kernel_size=KERNEL, stride=STRIDE)
    jax.block_until_ready(logits)

    assert logits.shape == (B, 2), logits.shape
    assert logits.dtype == jnp.float32

    # Pure-JAX reference of the same synthetic forward (same bf16 MXU precision)
    idx = jnp.arange(S)[:, None] * STRIDE + jnp.arange(KERNEL)[None, :]
    patches = x[:, idx]                                                   # (B, S, K)
    hid = jax.nn.gelu(
        jnp.dot(patches.astype(jnp.bfloat16),
                params["w_conv"].astype(jnp.bfloat16),
                preferred_element_type=jnp.float32) + params["b_conv"])
    pooled = hid.mean(axis=1)
    z1 = jnp.dot(pooled.astype(jnp.bfloat16), params["w1"].astype(jnp.bfloat16),
                 preferred_element_type=jnp.float32) + params["b1"]
    a1 = jnp.maximum(z1, 0.0)
    ref = jnp.dot(a1.astype(jnp.bfloat16), params["w2"].astype(jnp.bfloat16),
                  preferred_element_type=jnp.float32) + params["b2"]
    assert jnp.allclose(logits, ref, atol=1e-2, rtol=1e-2), (logits, ref)

    print("KERNEL_OK")
</pallas_src>

<mosaic_0001>
module attributes {stable_mosaic.version = 11 : i64} {
  func.func @fused_forward_kernel(%arg0: i32, %arg1: i32, %arg2: memref<8x8x128xbf16, #tpu.memory_space<vmem>>, %arg3: memref<128x128xbf16, #tpu.memory_space<vmem>>, %arg4: memref<1x128xf32, #tpu.memory_space<vmem>>, %arg5: memref<128x128xbf16, #tpu.memory_space<vmem>>, %arg6: memref<1x128xf32, #tpu.memory_space<vmem>>, %arg7: memref<128x128xbf16, #tpu.memory_space<vmem>>, %arg8: memref<1x128xf32, #tpu.memory_space<vmem>>, %arg9: memref<8x128xf32, #tpu.memory_space<vmem>>, %arg10: memref<8x128xf32, #tpu.memory_space<vmem>>) attributes {dimension_semantics = [#tpu.dimension_semantics<parallel>, #tpu.dimension_semantics<arbitrary>], iteration_bounds = array<i64: 1, 2>, scalar_prefetch = 0 : i64, scratch_operands = 1 : i64, tpu.core_type = #tpu.core_type<tc>, window_params = [{transform_indices = @transform_0, window_bounds = array<i64: 8, 8, 128>}, {pipeline_mode = #tpu.pipeline_mode<synchronous>, transform_indices = @transform_1, window_bounds = array<i64: 128, 128>}, {pipeline_mode = #tpu.pipeline_mode<synchronous>, transform_indices = @transform_2, window_bounds = array<i64: 1, 128>}, {pipeline_mode = #tpu.pipeline_mode<synchronous>, transform_indices = @transform_3, window_bounds = array<i64: 128, 128>}, {pipeline_mode = #tpu.pipeline_mode<synchronous>, transform_indices = @transform_4, window_bounds = array<i64: 1, 128>}, {pipeline_mode = #tpu.pipeline_mode<synchronous>, transform_indices = @transform_5, window_bounds = array<i64: 128, 128>}, {pipeline_mode = #tpu.pipeline_mode<synchronous>, transform_indices = @transform_6, window_bounds = array<i64: 1, 128>}, {transform_indices = @transform_7, window_bounds = array<i64: 8, 128>}]} {
    %c0_i32 = arith.constant 0 : i32
    %0 = arith.cmpi eq, %arg1, %c0_i32 : i32
    %1 = arith.extui %0 : i1 to i32
    %c0_i32_0 = arith.constant 0 : i32
    %2 = arith.cmpi ne, %1, %c0_i32_0 : i32
    scf.if %2 {
      %cst_17 = arith.constant 0.000000e+00 : f32
      %31 = vector.broadcast %cst_17 : f32 to vector<8x128xf32>
      %c0_18 = arith.constant 0 : index
      %c0_19 = arith.constant 0 : index
      %32 = vector.load %arg10[%c0_18, %c0_19] : memref<8x128xf32, #tpu.memory_space<vmem>>, vector<8x128xf32>
      tpu.vector_store %arg10[%c0_18, %c0_19], %31 {strides = array<i32>} : memref<8x128xf32, #tpu.memory_space<vmem>>, vector<8x128xf32>,
    } else {
    }
    %c0 = arith.constant 0 : index
    %c0_1 = arith.constant 0 : index
    %c0_2 = arith.constant 0 : index
    %3 = vector.load %arg2[%c0, %c0_1, %c0_2] : memref<8x8x128xbf16, #tpu.memory_space<vmem>>, vector<8x8x128xbf16>
    %4 = vector.shape_cast %3 : vector<8x8x128xbf16> to vector<64x128xbf16>
    %c0_3 = arith.constant 0 : index
    %c0_4 = arith.constant 0 : index
    %5 = vector.load %arg3[%c0_3, %c0_4] : memref<128x128xbf16, #tpu.memory_space<vmem>>, vector<128x128xbf16>
    %cst = arith.constant dense<0.000000e+00> : vector<64x128xf32>
    %6 = tpu.matmul %4, %5, %cst {dimension_numbers = #tpu.dot_dimension_numbers<[1], [0], [0], [1], [0, 0, 1, 1], [], []>} : vector<64x128xbf16>, vector<128x128xbf16>, vector<64x128xf32> -> vector<64x128xf32>
    %c0_5 = arith.constant 0 : index
    %c0_6 = arith.constant 0 : index
    %7 = vector.load %arg4[%c0_5, %c0_6] : memref<1x128xf32, #tpu.memory_space<vmem>>, vector<1x128xf32>
    %8 = vector.broadcast %7 : vector<1x128xf32> to vector<64x128xf32>
    %9 = arith.addf %6, %8 : vector<64x128xf32>
    %10 = arith.mulf %9, %9 : vector<64x128xf32>
    %11 = arith.mulf %9, %10 : vector<64x128xf32>
    %cst_7 = arith.constant 4.471500e-02 : f32
    %12 = vector.broadcast %cst_7 : f32 to vector<64x128xf32>
    %13 = arith.mulf %12, %11 : vector<64x128xf32>
    %14 = arith.addf %9, %13 : vector<64x128xf32>
    %cst_8 = arith.constant 0.797884583 : f32
    %15 = vector.broadcast %cst_8 : f32 to vector<64x128xf32>
    %16 = arith.mulf %15, %14 : vector<64x128xf32>
    %17 = math.tanh %16 : vector<64x128xf32>
    %cst_9 = arith.constant 1.000000e+00 : f32
    %18 = vector.broadcast %cst_9 : f32 to vector<64x128xf32>
    %19 = arith.addf %18, %17 : vector<64x128xf32>
    %cst_10 = arith.constant 5.000000e-01 : f32
    %20 = vector.broadcast %cst_10 : f32 to vector<64x128xf32>
    %21 = arith.mulf %20, %19 : vector<64x128xf32>
    %22 = arith.mulf %9, %21 : vector<64x128xf32>
    %c0_11 = arith.constant 0 : index
    %c0_12 = arith.constant 0 : index
    %23 = vector.load %arg10[%c0_11, %c0_12] : memref<8x128xf32, #tpu.memory_space<vmem>>, vector<8x128xf32>
    %24 = vector.shape_cast %22 : vector<64x128xf32> to vector<8x8x128xf32>
    %cst_13 = arith.constant dense<0.000000e+00> : vector<8x128xf32>
    %25 = vector.multi_reduction <add>, %24, %cst_13 [1] : vector<8x8x128xf32> to vector<8x128xf32>
    %26 = arith.addf %23, %25 : vector<8x128xf32>
    %c0_14 = arith.constant 0 : index
    %c0_15 = arith.constant 0 : index
    %27 = vector.load %arg10[%c0_14, %c0_15] : memref<8x128xf32, #tpu.memory_space<vmem>>, vector<8x128xf32>
    tpu.vector_store %arg10[%c0_14, %c0_15], %26 {strides = array<i32>} : memref<8x128xf32, #tpu.memory_space<vmem>>, vector<8x128xf32>,
    %c1_i32 = arith.constant 1 : i32
    %28 = arith.cmpi eq, %arg1, %c1_i32 : i32
    %29 = arith.extui %28 : i1 to i32
    %c0_i32_16 = arith.constant 0 : i32
    %30 = arith.cmpi ne, %29, %c0_i32_16 : i32
    scf.if %30 {
      %c0_17 = arith.constant 0 : index
      %c0_18 = arith.constant 0 : index
      %31 = vector.load %arg10[%c0_17, %c0_18] : memref<8x128xf32, #tpu.memory_space<vmem>>, vector<8x128xf32>
      %cst_19 = arith.constant 6.250000e-02 : f32
      %32 = vector.broadcast %cst_19 : f32 to vector<8x128xf32>
      %33 = arith.mulf %31, %32 : vector<8x128xf32>
      %34 = arith.truncf %33 : vector<8x128xf32> to vector<8x128xbf16>
      %c0_20 = arith.constant 0 : index
      %c0_21 = arith.constant 0 : index
      %35 = vector.load %arg5[%c0_20, %c0_21] : memref<128x128xbf16, #tpu.memory_space<vmem>>, vector<128x128xbf16>
      %cst_22 = arith.constant dense<0.000000e+00> : vector<8x128xf32>
      %36 = tpu.matmul %34, %35, %cst_22 {dimension_numbers = #tpu.dot_dimension_numbers<[1], [0], [0], [1], [0, 0, 1, 1], [], []>} : vector<8x128xbf16>, vector<128x128xbf16>, vector<8x128xf32> -> vector<8x128xf32>
      %c0_23 = arith.constant 0 : index
      %c0_24 = arith.constant 0 : index
      %37 = vector.load %arg6[%c0_23, %c0_24] : memref<1x128xf32, #tpu.memory_space<vmem>>, vector<1x128xf32>
      %38 = vector.broadcast %37 : vector<1x128xf32> to vector<8x128xf32>
      %39 = arith.addf %36, %38 : vector<8x128xf32>
      %cst_25 = arith.constant 0.000000e+00 : f32
      %40 = vector.broadcast %cst_25 : f32 to vector<8x128xf32>
      %41 = arith.maximumf %39, %40 : vector<8x128xf32>
      %42 = arith.truncf %41 : vector<8x128xf32> to vector<8x128xbf16>
      %c0_26 = arith.constant 0 : index
      %c0_27 = arith.constant 0 : index
      %43 = vector.load %arg7[%c0_26, %c0_27] : memref<128x128xbf16, #tpu.memory_space<vmem>>, vector<128x128xbf16>
      %cst_28 = arith.constant dense<0.000000e+00> : vector<8x128xf32>
      %44 = tpu.matmul %42, %43, %cst_28 {dimension_numbers = #tpu.dot_dimension_numbers<[1], [0], [0], [1], [0, 0, 1, 1], [], []>} : vector<8x128xbf16>, vector<128x128xbf16>, vector<8x128xf32> -> vector<8x128xf32>
      %c0_29 = arith.constant 0 : index
      %c0_30 = arith.constant 0 : index
      %45 = vector.load %arg8[%c0_29, %c0_30] : memref<1x128xf32, #tpu.memory_space<vmem>>, vector<1x128xf32>
      %46 = vector.broadcast %45 : vector<1x128xf32> to vector<8x128xf32>
      %47 = arith.addf %44, %46 : vector<8x128xf32>
      %c0_31 = arith.constant 0 : index
      %c0_32 = arith.constant 0 : index
      %48 = vector.load %arg9[%c0_31, %c0_32] : memref<8x128xf32, #tpu.memory_space<vmem>>, vector<8x128xf32>
      tpu.vector_store %arg9[%c0_31, %c0_32], %47 {strides = array<i32>} : memref<8x128xf32, #tpu.memory_space<vmem>>, vector<8x128xf32>,
    } else {
    }
    return
  }
  func.func @transform_0(%arg0: i32, %arg1: i32) -> (i32, i32, i32) {
    %c0_i32 = arith.constant 0 : i32
    %c0_i32_0 = arith.constant 0 : i32
    return %arg0, %arg1, %c0_i32 : i32, i32, i32
  }
  func.func @transform_1(%arg0: i32, %arg1: i32) -> (i32, i32) {
    %c0_i32 = arith.constant 0 : i32
    %c0_i32_0 = arith.constant 0 : i32
    %c0_i32_1 = arith.constant 0 : i32
    return %c0_i32, %c0_i32_0 : i32, i32
  }
  func.func @transform_2(%arg0: i32, %arg1: i32) -> (i32, i32) {
    %c0_i32 = arith.constant 0 : i32
    %c0_i32_0 = arith.constant 0 : i32
    %c0_i32_1 = arith.constant 0 : i32
    return %c0_i32, %c0_i32_0 : i32, i32
  }
  func.func @transform_3(%arg0: i32, %arg1: i32) -> (i32, i32) {
    %c0_i32 = arith.constant 0 : i32
    %c0_i32_0 = arith.constant 0 : i32
    %c0_i32_1 = arith.constant 0 : i32
    return %c0_i32, %c0_i32_0 : i32, i32
  }
  func.func @transform_4(%arg0: i32, %arg1: i32) -> (i32, i32) {
    %c0_i32 = arith.constant 0 : i32
    %c0_i32_0 = arith.constant 0 : i32
    %c0_i32_1 = arith.constant 0 : i32
    return %c0_i32, %c0_i32_0 : i32, i32
  }
  func.func @transform_5(%arg0: i32, %arg1: i32) -> (i32, i32) {
    %c0_i32 = arith.constant 0 : i32
    %c0_i32_0 = arith.constant 0 : i32
    %c0_i32_1 = arith.constant 0 : i32
    return %c0_i32, %c0_i32_0 : i32, i32
  }
  func.func @transform_6(%arg0: i32, %arg1: i32) -> (i32, i32) {
    %c0_i32 = arith.constant 0 : i32
    %c0_i32_0 = arith.constant 0 : i32
    %c0_i32_1 = arith.constant 0 : i32
    return %c0_i32, %c0_i32_0 : i32, i32
  }
  func.func @transform_7(%arg0: i32, %arg1: i32) -> (i32, i32) {
    %c0_i32 = arith.constant 0 : i32
    %c0_i32_0 = arith.constant 0 : i32
    return %arg0, %c0_i32 : i32, i32
  }
}

</mosaic_0001>

<bundles_post_ra>
// kernel: tpu_custom_call.1
= control target key start
LH: loop header
LB: loop body
LE: loop exit
PB: predicated region body
PF: predicated region fallthrough
CT: control target
= control target key end

     0   :  { %s1877_s0 = inlined_call_operand.hbm [shape: bf16[8,16,128], index: 0, kind: input, shape index: {}]   ;;  %s1878_s1 = inlined_call_operand.hbm [shape: bf16[128,128], index: 1, kind: input, shape index: {}]   ;;  %s1879_s2 = inlined_call_operand.vmem [shape: f32[1,128], index: 2, kind: input, shape index: {}]   ;;  %s1880_s3 = inlined_call_operand.hbm [shape: bf16[128,128], index: 3, kind: input, shape index: {}]   ;;  %s1881_s4 = inlined_call_operand.vmem [shape: f32[1,128], index: 4, kind: input, shape index: {}]   ;;  %s1882_s5 = inlined_call_operand.hbm [shape: bf16[128,128], index: 5, kind: input, shape index: {}]   ;;  %s1883_s6 = inlined_call_operand.vmem [shape: f32[1,128], index: 6, kind: input, shape index: {}]   ;;  %s1884_s7 = inlined_call_operand.hbm [shape: f32[8,128], index: 7, kind: output, shape index: {}]  }
   0x1   :  { %1893 = sst [smem:[#allocation17_spill]] %s1881_s4 }
   0x2   :  { %1894 = sst [smem:[#allocation18_spill]] %s1883_s6 }
   0x3   :  { %1895 = sst [smem:[#allocation19_spill]] %s1884_s7 }
   0x4   :  { %12 = vsyncpa [#allocation4], 0 }
   0x5   :  { %14 = vsyncpa [#allocation4 + $0x1], 0 }
   0x6   :  { %15 = vsyncpa [#allocation7], 0 }
   0x7   :  { %16 = vsyncpa [#allocation10], 0 }
   0x8   :  { %17 = vsyncpa [#allocation5], 0  ;;  %s1562_s24 = smov 0   ;;  %s1564_s25 = smov 0  }
   0x9   :  { %s1566_s26 = smov 0   ;;  %s1568_s27 = smov 0  }
   0xa   :  { %s1570_s28 = smov 0   ;;  %s1572_s29 = smov 0  }
   0xb LB: > { %1896 = sst [smem:[#allocation16_spill]] %s1509_s29  ;;  %s1890_s30 = sadd.s32 4294967295, %s1509_s29   ;;  %s1509_s29 = sphi %s1572_s29, %s23_s29   ;;  %s1505_s28 = sphi %s1570_s28, %s1918_s28   ;;  %s1501_s27 = sphi %s1568_s27, %s1917_s27   ;;  %s1497_s26 = sphi %s1566_s26, %s1916_s26   ;;  %s1493_s25 = sphi %s1564_s25, %s1915_s25   ;;  %s1489_s24 = sphi %s1562_s24, %s1914_s24  }
   0xc   : > { %p51_p0 = scmp.ne.s32.totalorder %s1497_s26, %s1493_s25  ;;  %p52_p1 = scmp.eq.s32.totalorder %s1509_s29, 0 }
   0xd   : > { %p57_p2 = scmp.ne.s32.totalorder %s1493_s25, %s1489_s24  ;;  %p1597_p3 = scmp.eq.s32.totalorder %s1890_s30, 0 }
   0xe   : > { %p1005_p4 = scmp.ge.s32.totalorder %s1509_s29, 1  ;;  %p53_p5 = por %p52_p1, %p51_p0 }
   0xf   : > { %s1897_s8 = scalar_select %p1597_p3, 1, 0 }
  0x10   : > { %p220_p6 = scmp.lt.s32.totalorder %s1509_s29, 3  ;;  %p1605_p7 = por %p1597_p3, %p57_p2 }
  0x11   : > { %s1511_s11 = smov [#allocation6]   ;;  %p1199_p11 = scmp.lt.s32.totalorder %s1509_s29, 2 }
  0x12   : > { %s1898_s9 = scalar_select %p1605_p7, 1, 0 }
  0x13   : > { %p1609_p8 = pnand %p1005_p4, %p220_p6  ;;  %s232_s12 = sshll.u32 %s1511_s11, 4  ;;  %s233_s12 = int_to_ptr.vmem [resolvable:$true] %s232_s12 }
  0x14   : > { %p1622_p12 = pnand %p1199_p11, %p53_p5  ;;  %s1307_s17 = scalar_lea.hbm %s1878_s1, 1024 }
  0x15   : > { %s1899_s10 = scalar_select %p1609_p8, 1, 0 }
  0x16   : > { %p1182_p9 = pneg %p1609_p8  ;;  %p1308_p13 = scmp.ne.s32.totalorder %s1878_s1, %s1307_s17 }
  0x17   : > { %s1901_s14 = scalar_select %p1622_p12, 1, 0 }
  0x18   : > { %p1617_p10 = pnand %p1182_p9, %p1597_p3  ;;  %p1314_p4 = scmp.lt.u32.totalorder %s1307_s17, %s1878_s1 }
  0x1a   : > { %p1634_p0 = pneg %p1617_p10 }
  0x1c   : > { %p1310_p1 = pnand %p1634_p0, %p1308_p13 }
  0x1e   : > { %p1311_p2 = pneg %p1310_p1 }
  0x20   : > { %p1316_p5 = pnand %p1314_p4, %p1311_p2 }
  0x22   : > { %1319 = shalt.err (!%p1316_p5)
}
  0x23   : > { %s1320_s23 = scalar_lea.vmem %s233_s12, 1024  ;;  %p1328_p3 = scmp.lt.s32.totalorder %s233_s12, %s233_s12 }
  0x24   : > { %p1321_p6 = scmp.ne.s32.totalorder %s233_s12, %s1320_s23  ;;  %p1329_p7 = scmp.lt.s32.totalorder %s1320_s23, %s1320_s23 }
  0x26   : > { %p1323_p9 = pnand %p1321_p6, %p1634_p0  ;;  %p1330_p8 = por %p1329_p7, %p1328_p3 }
  0x28   : > { %p1324_p11 = pneg %p1323_p9 }
  0x2a   : > { %p1331_p12 = pnand %p1330_p8, %p1324_p11 }
  0x2c   : > { %1334 = shalt.err (!%p1331_p12)
}
  0x2d   : > { %s1512_s24 = smov 64   ;;  %s1513_s11 = smov 4  }
  0x2e   : > { %1185 = dma.hbm_to_vmem [thread:$0]  (!%p1617_p10), %s1878_s1, 1024, %s233_s12, [#allocation7], %s1512_s24, %s1512_s24, %s1513_s11  }
  0x2f   : > { %s1514_s17 = smov [#allocation8]   ;;  %s1515_s19 = smov [#allocation9]  }
  0x30   : > { %s248_s18 = sshll.u32 %s1514_s17, 4  ;;  %s264_s21 = sshll.u32 %s1515_s19, 4  ;;  %s249_s18 = int_to_ptr.vmem [resolvable:$true] %s248_s18  ;;  %s265_s21 = int_to_ptr.vmem [resolvable:$true] %s264_s21 }
  0x31   : > { %s1335_s30 = scalar_lea.hbm %s1880_s3, 1024 }
  0x32   : > { %p1336_p3 = scmp.ne.s32.totalorder %s1880_s3, %s1335_s30  ;;  %p1342_p12 = scmp.lt.u32.totalorder %s1335_s30, %s1880_s3 }
  0x34   : > { %p1338_p7 = pnand %p1336_p3, %p1634_p0 }
  0x36   : > { %p1339_p8 = pneg %p1338_p7 }
  0x38   : > { %p1344_p13 = pnand %p1342_p12, %p1339_p8 }
  0x3a   : > { %1347 = shalt.err (!%p1344_p13)
}
  0x3b   : > { %s1348_s12 = scalar_lea.vmem %s249_s18, 1024  ;;  %p1356_p5 = scmp.lt.s32.totalorder %s249_s18, %s249_s18 }
  0x3c   : > { %p1349_p1 = scmp.ne.s32.totalorder %s249_s18, %s1348_s12  ;;  %p1357_p6 = scmp.lt.s32.totalorder %s1348_s12, %s1348_s12 }
  0x3e   : > { %p1351_p2 = pnand %p1349_p1, %p1634_p0  ;;  %p1358_p9 = por %p1357_p6, %p1356_p5 }
  0x40   : > { %p1352_p4 = pneg %p1351_p2 }
  0x42   : > { %p1359_p11 = pnand %p1358_p9, %p1352_p4 }
  0x44   : > { %1362 = shalt.err (!%p1359_p11)
}
  0x45   : > { %1188 = dma.hbm_to_vmem [thread:$0]  (!%p1617_p10), %s1880_s3, 1024, %s249_s18, [#allocation7], %s1512_s24, %s1512_s24, %s1513_s11  }
  0x46   : > { %s1363_s30 = scalar_lea.hbm %s1882_s5, 1024 }
  0x47   : > { %p1364_p3 = scmp.ne.s32.totalorder %s1882_s5, %s1363_s30  ;;  %p1370_p12 = scmp.lt.u32.totalorder %s1363_s30, %s1882_s5 }
  0x49   : > { %p1366_p7 = pnand %p1364_p3, %p1634_p0 }
  0x4b   : > { %p1367_p8 = pneg %p1366_p7 }
  0x4d   : > { %p1372_p13 = pnand %p1370_p12, %p1367_p8 }
  0x4f   : > { %1375 = shalt.err (!%p1372_p13)
}
  0x50   : > { %s1376_s22 = scalar_lea.vmem %s265_s21, 1024  ;;  %p1384_p5 = scmp.lt.s32.totalorder %s265_s21, %s265_s21 }
  0x51   : > { %p1377_p1 = scmp.ne.s32.totalorder %s265_s21, %s1376_s22  ;;  %p1385_p6 = scmp.lt.s32.totalorder %s1376_s22, %s1376_s22 }
  0x53   : > { %p1379_p2 = pnand %p1377_p1, %p1634_p0  ;;  %p1386_p9 = por %p1385_p6, %p1384_p5 }
  0x55   : > { %p1380_p4 = pneg %p1379_p2 }
  0x57   : > { %p1387_p11 = pnand %p1386_p9, %p1380_p4 }
  0x59   : > { %1390 = shalt.err (!%p1387_p11)
}
  0x5a   : > { %1191 = dma.hbm_to_vmem [thread:$0]  (!%p1617_p10), %s1882_s5, 1024, %s265_s21, [#allocation10], %s1512_s24, %s1512_s24, %s1513_s11  }
  0x5b   : > { %s44_s20 = sadd.s32 1, %s1497_s26  ;;  %s32_s12 = sadd.s32 1, %s1505_s28 }
  0x5c   : > { %s281_s4 = sand.u32 1, %s1497_s26   ;;  %p33_p0 = scmp.ge.s32.totalorder %s32_s12, 2 }
  0x5d   : > { %s1010_s13 = sshll.u32 %s281_s4, 5  ;;  %s1011_s6 = sshll.u32 %s1505_s28, 6 }
  0x5e   : > { %s1920_s12 = smov (%p33_p0, %s32_s12), 0  ;;  %s1704_s30 = scalar_lea.hbm %s1877_s0, %s1011_s6 }
  0x5f   : > { %s40_s21 = ssub.s32 %s1505_s28, %s1920_s12  ;;  %s285_s15 = scalar_lea.vmem [#allocation3], %s1010_s13 }
  0x60   : > { %s294_s16 = sshll.u32 %s285_s15, 4  ;;  %p42_p10 = scmp.eq.s32.totalorder %s40_s21, 0  ;;  %s1708_s16 = int_to_ptr.vmem [resolvable:$true] %s294_s16 }
  0x61   : > { %s1713_s19 = scalar_lea.sflag [#allocation4], %s281_s4  ;;  %s1391_s22 = scalar_lea.hbm %s1704_s30, 512 }
  0x62   : > { %s1711_s17 = scalar_select %p42_p10, %s1497_s26, %s44_s20  }
  0x63   : > { %p1392_p3 = scmp.ne.s32.totalorder %s1704_s30, %s1391_s22  ;;  %p1903_p7 = scmp.ne.s32.totalorder %s1901_s14, 0 }
  0x64   : > { %s1396_s13 = scalar_lea.hbm %s1877_s0, 1024  ;;  %p1397_p1 = scmp.lt.u32.totalorder %s1704_s30, %s1877_s0 }
  0x65   : > { %p1393_p8 = pneg %p1903_p7  ;;  %p1398_p2 = scmp.lt.u32.totalorder %s1396_s13, %s1391_s22 }
  0x66   : > { %p1400_p5 = scmp.lt.u32.totalorder %s1391_s22, %s1704_s30 }
  0x67   : > { %p1394_p12 = pnand %p1393_p8, %p1392_p3  ;;  %p1399_p4 = por %p1398_p2, %p1397_p1 }
  0x69   : > { %p1395_p13 = pneg %p1394_p12  ;;  %p1401_p6 = por %p1400_p5, %p1399_p4 }
  0x6b   : > { %p1402_p9 = pnand %p1401_p6, %p1395_p13 }
  0x6d   : > { %1405 = shalt.err (!%p1402_p9)
}
  0x6e   : > { %s1406_s20 = scalar_lea.vmem %s1708_s16, 512  ;;  %s1516_s4 = smov [#allocation3]  }
  0x6f   : > { %p1407_p11 = scmp.ne.s32.totalorder %s1708_s16, %s1406_s20  ;;  %s1411_s29 = sshll.u32 %s1516_s4, 4  ;;  %s1412_s29 = int_to_ptr.vmem [resolvable:$false] %s1411_s29 }
  0x70   : > { %s1413_s21 = scalar_lea.vmem %s1412_s29, 1024  ;;  %p1414_p3 = scmp.lt.s32.totalorder %s1708_s16, %s1412_s29 }
  0x71   : > { %p1409_p0 = pnand %p1407_p11, %p1393_p8  ;;  %p1415_p12 = scmp.lt.s32.totalorder %s1413_s21, %s1406_s20 }
  0x73   : > { %p1410_p10 = pneg %p1409_p0  ;;  %p1416_p1 = por %p1415_p12, %p1414_p3 }
  0x75   : > { %p1417_p2 = pnand %p1416_p1, %p1410_p10 }
  0x77   : > { %1420 = shalt.err (!%p1417_p2)
}
  0x78   : > { %s1517_s15 = smov 128   ;;  %p1904_p8 = scmp.ne.s32.totalorder %s1899_s10, 0 }
  0x79   : > { %1195 = dma.hbm_to_vmem [thread:$0]  (!%p1903_p7), %s1704_s30, 512, %s1708_s16, %s1713_s19, %s1517_s15, %s1512_s24, %s1513_s11  }
  0x7a   : > { %306 = sbr.rel (%p1904_p8) target bundleno = 931 (0x3a3), region = 48  ;;  %s308_s22 = sand.u32 (!%p1904_p8), 1, %s1493_s25  }
  0x7b   : > { %s1013_s18 = sshll.u32 (!%p1904_p8), %s308_s22, 5  ;;  %s309_s23 = scalar_lea.sflag (!%p1904_p8), [#allocation4], %s308_s22 }
  0x7c   : > { %s1746_s13 = scalar_lea.vmem (!%p1904_p8), [#allocation3], %s1013_s18  ;;  %p1905_p13 = scmp.ne.s32.totalorder (!%p1904_p8), %s1898_s9, 0 }
  0x81   : > { %1472 = dma.done.wait (%p1905_p13), %s309_s23, 512  }
  0x82   : > { %1474 = vsyncadd (%p1905_p13), %s309_s23, 4294966784  ;;  %p1906_p4 = scmp.ne.s32.totalorder %s1897_s8, 0 }
  0x84   : > { %1476 = dma.done.wait (%p1906_p4), [#allocation7], 2048  }
  0x85   : > { %1478 = vsyncadd (%p1906_p4), [#allocation7], 4294965248 }
  0x86   : > { %1480 = dma.done.wait (%p1906_p4), [#allocation10], 1024  }
  0x87   : > { %1482 = vsyncadd (%p1906_p4), [#allocation10], 4294966272  ;;  %p1017_p7 = scmp.ne.s32.totalorder %s1501_s27, 0 }
  0x88   : > { %v1518_v0 = vmov (!%p1017_p7), 0.0  }
  0x89   : > { %355 = sbr.rel (%p1017_p7) target bundleno = 144 (0x90), region = 68  ;;  %356 = vst [vmem:[#allocation2] sm:$0xff] (!%p1017_p7), %v1518_v0 }
  0x90 PF: > { %v1263_v1 = vld [vmem:[#allocation6] sm:$0xff]   ;;  %v1264_v2 = vld [vmem:[#allocation6 + $0x8] sm:$0xff]   ;;  %v1265_v3 = vld [vmem:[#allocation6 + $0x10] sm:$0xff]   ;;  %vm654_vm0 = vcmask 1041409   ;;  %vm656_vm1 = vcmask 1042434   ;;  %vm658_vm2 = vcmask 1043459  }
  0x91   : > { %1084 = vmatprep.subr.bf16.mxu0 %v1263_v1  ;;  %1148 = vmatprep.subr.bf16.mxu1 %v1263_v1  ;;  %v1266_v4 = vld [vmem:[#allocation6 + $0x18] sm:$0xff]   ;;  %v1271_v5 = vld [vmem:[%s1746_s13] sm:$0xff]   ;;  %v1272_v6 = vld [vmem:[%s1746_s13 + $0x10] sm:$0xff]   ;;  %vm660_vm3 = vcmask 1044484   ;;  %vm662_vm4 = vcmask 1045509   ;;  %vm664_vm5 = vcmask 1046534  }
  0x92   : > { %1085 = vmatpush3.bf16.msra.mxu0 %v1263_v1  ;;  %1156 = vmatpush3.bf16.msra.mxu1 %v1263_v1  ;;  %v1267_v7 = vld [vmem:[#allocation6 + $0x20] sm:$0xff]   ;;  %v1268_v8 = vld [vmem:[#allocation6 + $0x28] sm:$0xff]   ;;  %v1269_v9 = vld [vmem:[#allocation6 + $0x30] sm:$0xff]   ;;  %vm666_vm6 = vcmask 1047559   ;;  %p1031_p5 = scmp.ne.s32.totalorder %s1501_s27, 1 }
  0x93   : > { %1086 = vmatprep.subr.bf16.mxu0 %v1264_v2  ;;  %1149 = vmatprep.subr.bf16.mxu1 %v1264_v2  ;;  %v1270_v10 = vld [vmem:[#allocation6 + $0x38] sm:$0xff]   ;;  %v1273_v11 = vld [vmem:[%s1746_s13 + $0x8] sm:$0xff]   ;;  %vm1520_vm7 = vmmov (!%p1031_p5), 0   ;;  %s1907_s14 = sld [smem:[#allocation17_spill]] (!%p1031_p5)  ;;  %s1908_s30 = sld [smem:[#allocation18_spill]] (!%p1031_p5) }
  0x94   : > { %1100 = vmatprep.mubr.bf16.mxu0 %v1271_v5  ;;  %1104 = vmatprep.mubr.bf16.mxu1 %v1272_v6  ;;  %v1274_v12 = vld [vmem:[%s1746_s13 + $0x18] sm:$0xff]  }
  0x95   : > { %v1018_v13 = vld [vmem:[%s1879_s2] ss:$0 sm:$0xff] }
  0x96   : > { %1087 = vmatpush3.bf16.msra.mxu0 %v1264_v2  ;;  %1157 = vmatpush3.bf16.msra.mxu1 %v1264_v2 }
  0x97   : > { %1088 = vmatprep.subr.bf16.mxu0 %v1265_v3  ;;  %1150 = vmatprep.subr.bf16.mxu1 %v1265_v3 }
  0x9a   : > { %1089 = vmatpush3.bf16.msra.mxu0 %v1265_v3  ;;  %1158 = vmatpush3.bf16.msra.mxu1 %v1265_v3 }
  0x9b   : > { %1090 = vmatprep.subr.bf16.mxu0 %v1266_v4  ;;  %1151 = vmatprep.subr.bf16.mxu1 %v1266_v4 }
  0x9e   : > { %1091 = vmatpush3.bf16.msra.mxu0 %v1266_v4  ;;  %1159 = vmatpush3.bf16.msra.mxu1 %v1266_v4 }
  0x9f   : > { %1092 = vmatprep.subr.bf16.mxu0 %v1267_v7  ;;  %1152 = vmatprep.subr.bf16.mxu1 %v1267_v7 }
  0xa2   : > { %1093 = vmatpush3.bf16.msra.mxu0 %v1267_v7  ;;  %1160 = vmatpush3.bf16.msra.mxu1 %v1267_v7 }
  0xa3   : > { %1094 = vmatprep.subr.bf16.mxu0 %v1268_v8  ;;  %1153 = vmatprep.subr.bf16.mxu1 %v1268_v8 }
  0xa6   : > { %1095 = vmatpush3.bf16.msra.mxu0 %v1268_v8  ;;  %1161 = vmatpush3.bf16.msra.mxu1 %v1268_v8 }
  0xa7   : > { %1096 = vmatprep.subr.bf16.mxu0 %v1269_v9  ;;  %1154 = vmatprep.subr.bf16.mxu1 %v1269_v9 }
  0xaa   : > { %1097 = vmatpush3.bf16.msra.mxu0 %v1269_v9  ;;  %1162 = vmatpush3.bf16.msra.mxu1 %v1269_v9 }
  0xab   : > { %1098 = vmatprep.subr.bf16.mxu0 %v1270_v10  ;;  %1155 = vmatprep.subr.bf16.mxu1 %v1270_v10 }
  0xae   : > { %1099 = vmatpush3.bf16.msra.mxu0 %v1270_v10  ;;  %1163 = vmatpush3.bf16.msra.mxu1 %v1270_v10 }
  0xb1   : > { %1101 = vmatmul.mubr.bf16.vlgmr.msra.gmra.mrb[0].mxu0 %v1273_v11  ;;  %1105 = vmatmul.mubr.bf16.vlgmr.msra.gmra.mrb[0].mxu1 %v1274_v12 }
 0x184   : > { %v1102_v14 = vpop.f32.mrb[0].mxu0  ;;  %v1106_v15 = vpop.f32.mrb[0].mxu1 }
 0x185   : > { %v1768_v16 = vadd.f32 %v1102_v14, %v1018_v13  ;;  %v1770_v17 = vadd.f32 %v1106_v15, %v1018_v13  ;;  %v494_v18 = vpop.f32.mrb[1].mxu0  ;;  %v510_v19 = vpop.f32.mrb[1].mxu1 }
 0x186   : > { %v1772_v20 = vadd.f32 %v1018_v13, %v494_v18  ;;  %v1774_v21 = vadd.f32 %v1018_v13, %v510_v19  ;;  %v1103_v22 = vpop.f32.mrb[2].mxu0  ;;  %v1107_v23 = vpop.f32.mrb[2].mxu1 }
 0x187   : > { %v527_v24 = vmul.f32 %v1768_v16, %v1768_v16  ;;  %v531_v25 = vmul.f32 %v1770_v17, %v1770_v17  ;;  %v1780_v26 = vadd.f32 %v1103_v22, %v1018_v13  ;;  %v1782_v27 = vadd.f32 %v1107_v23, %v1018_v13  ;;  %v497_v28 = vpop.f32.mrb[3].mxu0  ;;  %v513_v29 = vpop.f32.mrb[3].mxu1 }
 0x188   : > { %v525_v30 = vmul.f32 %v1772_v20, %v1772_v20  ;;  %v529_v31 = vmul.f32 %v1774_v21, %v1774_v21  ;;  %v1788_v32 = vadd.f32 %v1018_v13, %v497_v28  ;;  %v1790_v33 = vadd.f32 %v1018_v13, %v513_v29 }
 0x189   : > { %v535_v34 = vmul.f32 %v527_v24, %v1768_v16  ;;  %v539_v35 = vmul.f32 %v531_v25, %v1770_v17  ;;  %v528_v36 = vmul.f32 %v1780_v26, %v1780_v26  ;;  %v532_v37 = vmul.f32 %v1782_v27, %v1782_v27 }
 0x18a   : > { %v533_v38 = vmul.f32 %v525_v30, %v1772_v20  ;;  %v537_v39 = vmul.f32 %v529_v31, %v1774_v21  ;;  %v526_v40 = vmul.f32 %v1788_v32, %v1788_v32  ;;  %v530_v41 = vmul.f32 %v1790_v33, %v1790_v33 }
 0x18b   : > { %v543_v42 = vmul.f32 0.044715, %v535_v34  ;;  %v547_v43 = vmul.f32 0.044715, %v539_v35  ;;  %v536_v44 = vmul.f32 %v528_v36, %v1780_v26  ;;  %v540_v45 = vmul.f32 %v532_v37, %v1782_v27 }
 0x18c   : > { %v541_v46 = vmul.f32 0.044715, %v533_v38  ;;  %v545_v47 = vmul.f32 0.044715, %v537_v39  ;;  %v534_v48 = vmul.f32 %v526_v40, %v1788_v32  ;;  %v538_v49 = vmul.f32 %v530_v41, %v1790_v33 }
 0x18d   : > { %v551_v50 = vadd.f32 %v543_v42, %v1768_v16  ;;  %v555_v51 = vadd.f32 %v547_v43, %v1770_v17  ;;  %v544_v52 = vmul.f32 0.044715, %v536_v44  ;;  %v548_v53 = vmul.f32 0.044715, %v540_v45 }
 0x18e   : > { %v549_v54 = vadd.f32 %v541_v46, %v1772_v20  ;;  %v553_v55 = vadd.f32 %v545_v47, %v1774_v21  ;;  %v542_v56 = vmul.f32 0.044715, %v534_v48  ;;  %v546_v57 = vmul.f32 0.044715, %v538_v49 }
 0x18f   : > { %v559_v58 = vmul.f32 0.7978846, %v551_v50  ;;  %v563_v59 = vmul.f32 0.7978846, %v555_v51  ;;  %v552_v60 = vadd.f32 %v544_v52, %v1780_v26  ;;  %v556_v61 = vadd.f32 %v548_v53, %v1782_v27 }
 0x190   : > { %v557_v62 = vmul.f32 0.7978846, %v549_v54  ;;  %v561_v63 = vmul.f32 0.7978846, %v553_v55  ;;  %v550_v0 = vadd.f32 %v542_v56, %v1788_v32  ;;  %v554_v1 = vadd.f32 %v546_v57, %v1790_v33 }
 0x191   : > { %1275 = vtanh.f32 %v559_v58  ;;  %v560_v2 = vmul.f32 0.7978846, %v552_v60  ;;  %v564_v3 = vmul.f32 0.7978846, %v556_v61 }
 0x192   : > { %1277 = vtanh.f32 %v563_v59  ;;  %v558_v4 = vmul.f32 0.7978846, %v550_v0  ;;  %v562_v5 = vmul.f32 0.7978846, %v554_v1 }
 0x193   : > { %1279 = vtanh.f32 %v557_v62 }
 0x194   : > { %1281 = vtanh.f32 %v561_v63 }
 0x195   : > { %1283 = vtanh.f32 %v560_v2 }
 0x196   : > { %1285 = vtanh.f32 %v564_v3 }
 0x197   : > { %1287 = vtanh.f32 %v558_v4 }
 0x198   : > { %1289 = vtanh.f32 %v562_v5 }
 0x19b   : > { %v1276_v6 = vpop.eup %1275 }
 0x19c   : > { %v1278_v7 = vpop.eup %1277  ;;  %v575_v8 = vadd.f32 1.0, %v1276_v6 }
 0x19d   : > { %v1280_v9 = vpop.eup %1279  ;;  %v579_v10 = vadd.f32 1.0, %v1278_v7 }
 0x19e   : > { %v1282_v11 = vpop.eup %1281  ;;  %v583_v12 = vmul.f32 0.5, %v575_v8  ;;  %v573_v13 = vadd.f32 1.0, %v1280_v9 }
 0x19f   : > { %v1284_v14 = vpop.eup %1283  ;;  %v587_v15 = vmul.f32 0.5, %v579_v10  ;;  %v577_v18 = vadd.f32 1.0, %v1282_v11 }
 0x1a0   : > { %v1286_v19 = vpop.eup %1285  ;;  %v591_v22 = vmul.f32 %v583_v12, %v1768_v16  ;;  %v581_v23 = vmul.f32 0.5, %v573_v13  ;;  %v576_v24 = vadd.f32 1.0, %v1284_v14 }
 0x1a1   : > { %v1288_v25 = vpop.eup %1287  ;;  %v595_v28 = vmul.f32 %v587_v15, %v1770_v17  ;;  %v585_v29 = vmul.f32 0.5, %v577_v18  ;;  %v580_v30 = vadd.f32 1.0, %v1286_v19 }
 0x1a2   : > { %v1290_v31 = vpop.eup %1289  ;;  %v610_v34 = vrot.slane %v591_v22, 4  ;;  %v589_v35 = vmul.f32 %v581_v23, %v1772_v20  ;;  %v584_v36 = vmul.f32 0.5, %v576_v24  ;;  %v574_v37 = vadd.f32 1.0, %v1288_v25 }
 0x1a3   : > { %v634_v38 = vrot.slane %v595_v28, 4  ;;  %v593_v39 = vmul.f32 %v585_v29, %v1774_v21  ;;  %v588_v40 = vmul.f32 0.5, %v580_v30  ;;  %v578_v41 = vadd.f32 1.0, %v1290_v31 }
 0x1a4   : > { %v611_v42 = vadd.f32 %v610_v34, %v591_v22  ;;  %v598_v16 = vrot.slane %v589_v35, 4  ;;  %v592_v43 = vmul.f32 %v584_v36, %v1780_v26  ;;  %v582_v44 = vmul.f32 0.5, %v574_v37  ;;  %v597_v34 = vld [vmem:[#allocation2] sm:$0xff] }
 0x1a5   : > { %v622_v45 = vrot.slane %v593_v39, 4  ;;  %v596_v17 = vmul.f32 %v588_v40, %v1782_v27  ;;  %v586_v46 = vmul.f32 0.5, %v578_v41  ;;  %v635_v47 = vadd.f32 %v634_v38, %v595_v28  ;;  %v1292_v41 = vld [vmem:[#allocation8 + $0x8] sm:$0xff] (!%p1031_p5)  }
 0x1a6   : > { %v599_v48 = vadd.f32 %v598_v16, %v589_v35  ;;  %v616_v49 = vrot.slane %v592_v43, 4  ;;  %v590_v20 = vmul.f32 %v582_v44, %v1788_v32  ;;  %v612_v50 = vrot.slane %v611_v42, 2  ;;  %v1299_v16 = vld [vmem:[#allocation9] sm:$0xff] (!%p1031_p5)   ;;  %v1300_v44 = vld [vmem:[#allocation9 + $0x8] sm:$0xff] (!%p1031_p5)  }
 0x1a7   : > { %v623_v51 = vadd.f32 %v622_v45, %v593_v39  ;;  %v640_v52 = vrot.slane %v596_v17, 4  ;;  %v594_v21 = vmul.f32 %v586_v46, %v1790_v33  ;;  %v636_v61 = vrot.slane %v635_v47, 2  ;;  %v1291_v39 = vld [vmem:[#allocation8] sm:$0xff] (!%p1031_p5)   ;;  %v1296_v46 = vld [vmem:[#allocation8 + $0x28] sm:$0xff] (!%p1031_p5)  }
 0x1a8   : > { %v600_v53 = vrot.slane %v599_v48, 2  ;;  %v617_v54 = vadd.f32 %v616_v49, %v592_v43  ;;  %v604_v55 = vrot.slane %v590_v20, 4  ;;  %v613_v60 = vadd.f32 %v612_v50, %v611_v42  ;;  %v1293_v42 = vld [vmem:[#allocation8 + $0x10] sm:$0xff] (!%p1031_p5)   ;;  %v1294_v43 = vld [vmem:[#allocation8 + $0x18] sm:$0xff] (!%p1031_p5)   ;;  %v1295_v45 = vld [vmem:[#allocation8 + $0x20] sm:$0xff] (!%p1031_p5)  }
 0x1a9   : > { %v624_v56 = vrot.slane %v623_v51, 2  ;;  %v641_v26 = vadd.f32 %v640_v52, %v596_v17  ;;  %v628_v57 = vrot.slane %v594_v21, 4  ;;  %v637_v5 = vadd.f32 %v636_v61, %v635_v47  ;;  %v1301_v17 = vld [vmem:[#allocation9 + $0x10] sm:$0xff] (!%p1031_p5)   ;;  %v1302_v47 = vld [vmem:[#allocation9 + $0x18] sm:$0xff] (!%p1031_p5)   ;;  %v1304_v52 = vld [vmem:[#allocation9 + $0x28] sm:$0xff] (!%p1031_p5)  }
 0x1aa   : > { %v601_v58 = vadd.f32 %v600_v53, %v599_v48  ;;  %v618_v59 = vrot.slane %v617_v54, 2  ;;  %v605_v27 = vadd.f32 %v604_v55, %v590_v20  ;;  %v614_v33 = vrot.slane %v613_v60, 1  ;;  %v1297_v48 = vld [vmem:[#allocation8 + $0x30] sm:$0xff] (!%p1031_p5)   ;;  %v1303_v20 = vld [vmem:[#allocation9 + $0x20] sm:$0xff] (!%p1031_p5)   ;;  %v1032_v55 = vld [vmem:[%s1907_s14] ss:$0 sm:$0xff] (!%p1031_p5) }
 0x1ab   : > { %v629_v62 = vadd.f32 %v628_v57, %v594_v21  ;;  %v642_v0 = vrot.slane %v641_v26, 2  ;;  %v625_v1 = vadd.f32 %v624_v56, %v623_v51  ;;  %v638_v15 = vrot.slane %v637_v5, 1  ;;  %v1298_v51 = vld [vmem:[#allocation8 + $0x38] sm:$0xff] (!%p1031_p5)   ;;  %v1305_v53 = vld [vmem:[#allocation9 + $0x30] sm:$0xff] (!%p1031_p5)  }
 0x1ac   : > { %v619_v63 = vadd.f32 %v618_v59, %v617_v54  ;;  %v606_v32 = vrot.slane %v605_v27, 2  ;;  %v602_v3 = vrot.slane %v601_v58, 1  ;;  %v615_v14 = vadd.f32 %v614_v33, %v613_v60  ;;  %v1306_v54 = vld [vmem:[#allocation9 + $0x38] sm:$0xff] (!%p1031_p5)  }
 0x1ad   : > { %v630_v2 = vrot.slane %v629_v62, 2  ;;  %v643_v8 = vadd.f32 %v642_v0, %v641_v26  ;;  %v626_v10 = vrot.slane %v625_v1, 1  ;;  %v639_v29 = vadd.f32 %v638_v15, %v637_v5  ;;  %v1041_v61 = vld [vmem:[%s1908_s30] ss:$0 sm:$0xff] (!%p1031_p5) }
 0x1ae   : > { %v607_v4 = vadd.f32 %v606_v32, %v605_v27  ;;  %v620_v7 = vrot.slane %v619_v63, 1  ;;  %v603_v11 = vadd.f32 %v602_v3, %v601_v58  ;;  %v1519_v40 = vmov (!%p1031_p5), 0.0  }
 0x1af   : > { %v631_v6 = vadd.f32 %v630_v2, %v629_v62  ;;  %v644_v19 = vrot.slane %v643_v8, 1  ;;  %v627_v23 = vadd.f32 %v626_v10, %v625_v1  ;;  %1108 = vmatprep.subr.bf16.mxu0 (!%p1031_p5), %v1519_v40  ;;  %1128 = vmatprep.subr.bf16.mxu1 (!%p1031_p5), %v1519_v40 }
 0x1b0   : > { %v608_v9 = vrot.slane %v607_v4, 1  ;;  %v621_v18 = vadd.f32 %v620_v7, %v619_v63  ;;  %1109 = vmatpush3.bf16.msra.mxu0 (!%p1031_p5), %v1291_v39  ;;  %1124 = vmatprep.mubr.msk.bf16.mxu0 (!%p1031_p5), %vm1520_vm7, %v1519_v40 }
 0x1b1   : > { %v632_v13 = vrot.slane %v631_v6, 1  ;;  %v645_v31 = vadd.f32 %v644_v19, %v643_v8  ;;  %1110 = vmatprep.subr.bf16.mxu0 (!%p1031_p5), %v1519_v40  ;;  %1144 = vmatprep.mubr.msk.bf16.mxu1 (!%p1031_p5), %vm1520_vm7, %v1519_v40 }
 0x1b2   : > { %v609_v12 = vadd.f32 %v608_v9, %v607_v4  ;;  %1129 = vmatpush3.bf16.msra.mxu1 (!%p1031_p5), %v1299_v16 }
 0x1b3   : > { %v633_v25 = vadd.f32 %v632_v13, %v631_v6  ;;  %1130 = vmatprep.subr.bf16.mxu1 (!%p1031_p5), %v1519_v40 }
 0x1b4   : > { %v655_v22 = vsel %vm654_vm0, %v609_v12, %v603_v11  ;;  %1111 = vmatpush3.bf16.msra.mxu0 (!%p1031_p5), %v1292_v41 }
 0x1b5   : > { %v657_v24 = vsel %vm656_vm1, %v615_v14, %v655_v22  ;;  %1112 = vmatprep.subr.bf16.mxu0 (!%p1031_p5), %v1519_v40 }
 0x1b6   : > { %v659_v28 = vsel %vm658_vm2, %v621_v18, %v657_v24  ;;  %1131 = vmatpush3.bf16.msra.mxu1 (!%p1031_p5), %v1300_v44 }
 0x1b7   : > { %v661_v30 = vsel %vm660_vm3, %v627_v23, %v659_v28  ;;  %674 = sbr.rel (%p1031_p5) target bundleno = 896 (0x380), region = 72  ;;  %1132 = vmatprep.subr.bf16.mxu1 (!%p1031_p5), %v1519_v40 }
 0x1b8   : > { %v663_v35 = vsel %vm662_vm4, %v633_v25, %v661_v30  ;;  %1113 = vmatpush3.bf16.msra.mxu0 (!%p1031_p5), %v1293_v42 }
 0x1b9   : > { %v665_v36 = vsel %vm664_vm5, %v639_v29, %v663_v35  ;;  %1114 = vmatprep.subr.bf16.mxu0 (!%p1031_p5), %v1519_v40 }
 0x1ba   : > { %v667_v37 = vsel %vm666_vm6, %v645_v31, %v665_v36  ;;  %1133 = vmatpush3.bf16.msra.mxu1 (!%p1031_p5), %v1301_v17 }
 0x1bb   : > { %v669_v38 = vadd.f32 %v667_v37, %v597_v34  ;;  %1134 = vmatprep.subr.bf16.mxu1 (!%p1031_p5), %v1519_v40 }
 0x1bc   : > { %1115 = vmatpush3.bf16.msra.mxu0 (!%p1031_p5), %v1294_v43 }
 0x1bd   : > { %670 = vst [vmem:[#allocation2] sm:$0xff] %v669_v38  ;;  %1116 = vmatprep.subr.bf16.mxu0 (!%p1031_p5), %v1519_v40 }
 0x1be   : > { %1135 = vmatpush3.bf16.msra.mxu1 %v1302_v47 }
 0x1bf   : > { %1136 = vmatprep.subr.bf16.mxu1 %v1519_v40 }
 0x1c0   : > { %1117 = vmatpush3.bf16.msra.mxu0 %v1295_v45 }
 0x1c1   : > { %1118 = vmatprep.subr.bf16.mxu0 %v1519_v40 }
 0x1c2   : > { %1137 = vmatpush3.bf16.msra.mxu1 %v1303_v20 }
 0x1c3   : > { %1138 = vmatprep.subr.bf16.mxu1 %v1519_v40 }
 0x1c4   : > { %1119 = vmatpush3.bf16.msra.mxu0 %v1296_v46  ;;  %v675_v49 = vld [vmem:[#allocation2] sm:$0xff] }
 0x1c5   : > { %1120 = vmatprep.subr.bf16.mxu0 %v1519_v40  ;;  %v676_v50 = vmul.f32 0.0625, %v675_v49 }
 0x1c6   : > { %1139 = vmatpush3.bf16.msra.mxu1 %v1304_v52 }
 0x1c7   : > { %v677_v21 = vpack.c.bf16 %v676_v50, %v676_v50  ;;  %1140 = vmatprep.subr.bf16.mxu1 %v1519_v40 }
 0x1c8   : > { %1121 = vmatpush3.bf16.msra.mxu0 %v1297_v48 }
 0x1c9   : > { %1122 = vmatprep.subr.bf16.mxu0 %v1519_v40 }
 0x1ca   : > { %1141 = vmatpush3.bf16.msra.mxu1 %v1305_v53 }
 0x1cb   : > { %1142 = vmatprep.subr.bf16.mxu1 %v1519_v40 }
 0x1cc   : > { %1123 = vmatpush3.bf16.msra.mxu0 %v1298_v51 }
 0x1ce   : > { %1143 = vmatpush3.bf16.msra.mxu1 %v1306_v54 }
 0x1cf   : > { %1125 = vmatmul.mubr.bf16.vlgmr.msra.gmra.mrb[0].mxu0 %v677_v21 }
 0x2a2   : > { %v783_v56 = vpop.f32.mrb[0].mxu0 }
 0x2a3   : > { %v784_v26 = vadd.f32 %v1032_v55, %v783_v56  ;;  %v1126_v57 = vpop.f32.mrb[1].mxu0 }
 0x2a4   : > { %v786_v58 = vpop.f32.mrb[2].mxu0 }
 0x2a5   : > { %v789_v59 = vmax.f32 %v784_v26, 0.0  ;;  %v1127_v27 = vpop.f32.mrb[3].mxu0 }
 0x2a7   : > { %v790_v60 = vpack.c.bf16 %v789_v59, %v789_v59 }
 0x2a9   : > { %1145 = vmatmul.mubr.bf16.vlgmr.msra.gmra.mrb[0].mxu1 %v790_v60 }
 0x37c   : > { %v896_v62 = vpop.f32.mrb[0].mxu1 }
 0x37d   : > { %v897_v63 = vadd.f32 %v1041_v61, %v896_v62  ;;  %v1146_v0 = vpop.f32.mrb[1].mxu1 }
 0x37e   : > { %v899_v32 = vpop.f32.mrb[2].mxu1 }
 0x37f   : > { %902 = vst [vmem:[#allocation11] sm:$0xff] %v897_v63  ;;  %v1147_v1 = vpop.f32.mrb[3].mxu1 }
 0x380 PF: > { %s1909_s16 = sld [smem:[#allocation16_spill]]  ;;  %s1521_s7 = smov [#allocation11]  }
 0x381   : > { %s912_s20 = sshll.u32 %s1521_s7, 4  ;;  %s913_s20 = int_to_ptr.vmem [resolvable:$true] %s912_s20 }
 0x382   : > { %s1421_s4 = scalar_lea.vmem %s913_s20, 128  ;;  %p1428_p10 = scmp.lt.s32.totalorder %s913_s20, %s913_s20 }
 0x383   : > { %p1422_p9 = scmp.ne.s32.totalorder %s913_s20, %s1421_s4  ;;  %p1429_p3 = scmp.lt.s32.totalorder %s1421_s4, %s1421_s4 }
 0x385   : > { %p1430_p12 = por %p1429_p3, %p1428_p10 }
 0x386   : > { %s1910_s19 = sadd.s32 4294967295, %s1909_s16  }
 0x387   : > { %p1833_p6 = scmp.eq.s32.totalorder %s1910_s19, 1 }
 0x389   : > { %p1423_p11 = pnand %p1422_p9, %p1833_p6 }
 0x38b   : > { %p1424_p0 = pneg %p1423_p11 }
 0x38d   : > { %p1431_p1 = pnand %p1430_p12, %p1424_p0 }
 0x38f   : > { %1434 = shalt.err (!%p1431_p1)
}
 0x390   : > { %s1912_s15 = sld [smem:[#allocation19_spill]] }
 0x396   : > { %s1435_s22 = scalar_lea.hbm %s1912_s15, 128 }
 0x397   : > { %p1436_p2 = scmp.ne.s32.totalorder %s1912_s15, %s1435_s22  ;;  %p1441_p4 = scmp.lt.u32.totalorder %s1435_s22, %s1912_s15 }
 0x399   : > { %p1437_p8 = pnand %p1436_p2, %p1833_p6 }
 0x39b   : > { %p1438_p13 = pneg %p1437_p8 }
 0x39d   : > { %p1443_p7 = pnand %p1441_p4, %p1438_p13 }
 0x39f   : > { %1446 = shalt.err (!%p1443_p7)
}
 0x3a0   : > { %1179 = dma.vmem_to_hbm [thread:$0]  (%p1833_p6), %s913_s20, 128, %s1912_s15, [#allocation5]  }
 0x3a1   : > { %1484 = dma.done.wait (%p1833_p6), [#allocation5], 128  }
 0x3a2   : > { %1486 = vsyncadd (%p1833_p6), [#allocation5], 4294967168 }
 0x3a3 PF: > { %s1913_s10 = sld [smem:[#allocation16_spill]]  ;;  %s1914_s24 = smov %s1493_s25 }
 0x3a4   : > { %s1915_s25 = smov %s1497_s26  ;;  %s1916_s26 = smov %s1711_s17 }
 0x3a5   : > { %s1917_s27 = smov %s1505_s28  ;;  %s1918_s28 = smov %s1920_s12 }
 0x3a9   : > { %s23_s29 = sadd.s32 1, %s1913_s10  }
 0x3aa   : > { %p20_p5 = scmp.ge.s32.totalorder %s23_s29, 4  }
 0x3ac   :  { %22 = sbr.rel (!%p20_p5) target bundleno = 11 (0xb), region = 106 }
 0x3b3   :  { %925 = vsyncpa [#allocation4], 1 }
 0x3b4   :  { %927 = vsyncpa [#allocation4 + $0x1], 1 }
 0x3b5   :  { %928 = vsyncpa [#allocation7], 1 }
 0x3b6   :  { %929 = vsyncpa [#allocation10], 1 }
 0x3b7   :  { %930 = vsyncpa [#allocation5], 1 }
 0x3b8   :  { %932 = vsyncpa [#allocation5 + $0x1], 1 }

</bundles_post_ra>
